<compile_context>
chip_gen: v5e
topology: v5e:2x2
jax: 0.10.0
libtpu: 0.0.40
codegen_flags: <defaults>
</compile_context>

<pallas_src>
import functools

import jax
import jax.numpy as jnp
from jax.experimental import pallas as pl
from jax.experimental.pallas import tpu as pltpu

NEG_SLOPE = 0.01  # nn.LeakyReLU() default negative_slope
LANE = 128


def _round_up(n, m):
    return ((n + m - 1) // m) * m


def _leaky_relu(x):
    # single mul + max on the VPU (cheaper than compare + select)
    return jnp.maximum(x, NEG_SLOPE * x)


def mlp_kernel(x_ref,
               w1_ref, b1_ref,
               w2_ref, b2_ref,
               w3_ref, b3_ref,
               w4_ref, b4_ref,
               o_ref, *, compute_dtype):
    """One batch tile: 4x (MXU matmul -> VPU bias + LeakyReLU)."""
    dt = compute_dtype

    def dense(h, w_ref, b_ref):
        acc = jnp.dot(h.astype(dt), w_ref[...].astype(dt),
                      preferred_element_type=jnp.float32)
        return _leaky_relu(acc + b_ref[...])

    h = dense(x_ref[...], w1_ref, b1_ref)
    h = dense(h, w2_ref, b2_ref)
    h = dense(h, w3_ref, b3_ref)
    h = dense(h, w4_ref, b4_ref)
    o_ref[...] = h.astype(o_ref.dtype)


def _pad_params(params):
    """Zero-pad each layer's in/out feature dims up to a multiple of 128 lanes.

    Exactness: padded weight rows/cols and bias lanes are zero, and
    LeakyReLU(0) == 0, so padded lanes stay zero through every layer.
    """
    w_shapes = [params[f"w{i}"].shape for i in range(1, 5)]
    # padded input dim per layer (layer-1 input dim is left as-is: it is not a lane dim
    # of any activation block that needs 128-alignment; block covers the full extent)
    in_p = [w_shapes[0][0]] + [_round_up(s[1], LANE) for s in w_shapes[:-1]]
    out_p = [_round_up(s[1], LANE) for s in w_shapes]

    padded = {}
    for i in range(1, 5):
        w, b = params[f"w{i}"], params[f"b{i}"]
        wi, wo = w.shape
        padded[f"w{i}"] = jnp.pad(w, ((0, in_p[i - 1] - wi), (0, out_p[i - 1] - wo)))
        padded[f"b{i}"] = jnp.pad(b, ((0, 0), (0, out_p[i - 1] - wo)))
    return padded


def neural_net_forward(x, params, *, block_m=512, compute_dtype=jnp.float32):
    """x: (B, input_size) f32. params: dict of (W_k, b_k), W_k (in, out), b_k (1, out).

    Returns (B, output_size) f32, identical semantics to NeuralNet.forward.
    """
    B, in_size = x.shape
    out_size = params["w4"].shape[1]

    pp = _pad_params(params)
    out_pad = pp["w4"].shape[1]

    # Batch tile: multiple of 8 sublanes, capped at block_m (sized for v7x 64 MiB VMEM).
    bm = min(block_m, _round_up(B, 8))
    b_pad = _round_up(B, bm)
    if b_pad != B:
        x = jnp.pad(x, ((0, b_pad - B), (0, 0)))
    grid = (b_pad // bm,)

    # x / out: tiled over batch. Weights / biases: full-array blocks, constant
    # index_map -> VMEM-resident across all grid iterations.
    in_specs = [pl.BlockSpec((bm, in_size), lambda i: (i, 0))]
    args = [x]
    for name in ("w1", "b1", "w2", "b2", "w3", "b3", "w4", "b4"):
        a = pp[name]
        in_specs.append(pl.BlockSpec(a.shape, lambda i: (0, 0)))
        args.append(a)
    out_spec = pl.BlockSpec((bm, out_pad), lambda i: (i, 0))

    kernel = functools.partial(mlp_kernel, compute_dtype=compute_dtype)

    out = pl.pallas_call(
        kernel,
        out_shape=jax.ShapeDtypeStruct((b_pad, out_pad), jnp.float32),
        grid=grid,
        in_specs=in_specs,
        out_specs=out_spec,
        compiler_params=pltpu.CompilerParams(
            dimension_semantics=("parallel",)),   # dual-TC sharding on v7x
    )(*args)

    # Strip batch and lane padding (padded output lanes are exactly zero).
    return out[:B, :out_size]


def init_params(key, input_size, h1, h2, h3, output_size):
    """Deterministic init mimicking PyTorch nn.Linear default U(-1/sqrt(fan_in), +)."""
    params = {}
    dims = [(input_size, h1), (h1, h2), (h2, h3), (h3, output_size)]
    for i, (fan_in, fan_out) in enumerate(dims, start=1):
        key, kw, kb = jax.random.split(key, 3)
        bound = 1.0 / jnp.sqrt(float(fan_in))
        params[f"w{i}"] = jax.random.uniform(
            kw, (fan_in, fan_out), jnp.float32, minval=-bound, maxval=bound)
        params[f"b{i}"] = jax.random.uniform(
            kb, (1, fan_out), jnp.float32, minval=-bound, maxval=bound)
    return params


def reference_forward(x, params):
    h = x
    for i in range(1, 5):
        h = h @ params[f"w{i}"] + params[f"b{i}"]
        h = jnp.where(h > 0, h, NEG_SLOPE * h)
    return h


if __name__ == "__main__":
    # Small shapes consistent with the module: a handful of CSV features per sample,
    # hidden sizes 120, scalar output.
    batch = 8
    input_size = 8
    hidden_size1 = hidden_size2 = hidden_size3 = 120
    output_size = 1

    key = jax.random.PRNGKey(0)
    key, kx = jax.random.split(key)
    x = jax.random.normal(kx, (batch, input_size), dtype=jnp.float32)
    params = init_params(key, input_size, hidden_size1, hidden_size2,
                         hidden_size3, output_size)

    out = neural_net_forward(x, params)
    out = jax.block_until_ready(out)

    ref = reference_forward(x, params)
    assert out.shape == (batch, output_size)
    assert jnp.allclose(out, ref, atol=1e-4, rtol=1e-4), "mismatch vs reference"

    print("KERNEL_OK")
</pallas_src>

<mosaic_0001>
module attributes {stable_mosaic.version = 11 : i64} {
  func.func @mlp_kernel(%arg0: i32, %arg1: memref<8x8xf32, #tpu.memory_space<vmem>>, %arg2: memref<8x128xf32, #tpu.memory_space<vmem>>, %arg3: memref<1x128xf32, #tpu.memory_space<vmem>>, %arg4: memref<128x128xf32, #tpu.memory_space<vmem>>, %arg5: memref<1x128xf32, #tpu.memory_space<vmem>>, %arg6: memref<128x128xf32, #tpu.memory_space<vmem>>, %arg7: memref<1x128xf32, #tpu.memory_space<vmem>>, %arg8: memref<128x128xf32, #tpu.memory_space<vmem>>, %arg9: memref<1x128xf32, #tpu.memory_space<vmem>>, %arg10: memref<8x128xf32, #tpu.memory_space<vmem>>) attributes {dimension_semantics = [#tpu.dimension_semantics<parallel>], iteration_bounds = array<i64: 1>, scalar_prefetch = 0 : i64, scratch_operands = 0 : i64, tpu.core_type = #tpu.core_type<tc>, window_params = [{transform_indices = @transform_0, window_bounds = array<i64: 8, 8>}, {pipeline_mode = #tpu.pipeline_mode<synchronous>, transform_indices = @transform_1, window_bounds = array<i64: 8, 128>}, {pipeline_mode = #tpu.pipeline_mode<synchronous>, transform_indices = @transform_2, window_bounds = array<i64: 1, 128>}, {pipeline_mode = #tpu.pipeline_mode<synchronous>, transform_indices = @transform_3, window_bounds = array<i64: 128, 128>}, {pipeline_mode = #tpu.pipeline_mode<synchronous>, transform_indices = @transform_4, window_bounds = array<i64: 1, 128>}, {pipeline_mode = #tpu.pipeline_mode<synchronous>, transform_indices = @transform_5, window_bounds = array<i64: 128, 128>}, {pipeline_mode = #tpu.pipeline_mode<synchronous>, transform_indices = @transform_6, window_bounds = array<i64: 1, 128>}, {pipeline_mode = #tpu.pipeline_mode<synchronous>, transform_indices = @transform_7, window_bounds = array<i64: 128, 128>}, {pipeline_mode = #tpu.pipeline_mode<synchronous>, transform_indices = @transform_8, window_bounds = array<i64: 1, 128>}, {transform_indices = @transform_9, window_bounds = array<i64: 8, 128>}]} {
    %c0 = arith.constant 0 : index
    %c0_0 = arith.constant 0 : index
    %0 = vector.load %arg1[%c0, %c0_0] : memref<8x8xf32, #tpu.memory_space<vmem>>, vector<8x8xf32>
    %c0_1 = arith.constant 0 : index
    %c0_2 = arith.constant 0 : index
    %1 = vector.load %arg2[%c0_1, %c0_2] : memref<8x128xf32, #tpu.memory_space<vmem>>, vector<8x128xf32>
    %cst = arith.constant dense<0.000000e+00> : vector<8x128xf32>
    %2 = tpu.matmul %0, %1, %cst {dimension_numbers = #tpu.dot_dimension_numbers<[1], [0], [0], [1], [0, 0, 1, 1], [], []>} : vector<8x8xf32>, vector<8x128xf32>, vector<8x128xf32> -> vector<8x128xf32>
    %c0_3 = arith.constant 0 : index
    %c0_4 = arith.constant 0 : index
    %3 = vector.load %arg3[%c0_3, %c0_4] : memref<1x128xf32, #tpu.memory_space<vmem>>, vector<1x128xf32>
    %4 = vector.broadcast %3 : vector<1x128xf32> to vector<8x128xf32>
    %5 = arith.addf %2, %4 : vector<8x128xf32>
    %cst_5 = arith.constant 0.00999999977 : f32
    %6 = vector.broadcast %cst_5 : f32 to vector<8x128xf32>
    %7 = arith.mulf %6, %5 : vector<8x128xf32>
    %8 = arith.maximumf %5, %7 : vector<8x128xf32>
    %c0_6 = arith.constant 0 : index
    %c0_7 = arith.constant 0 : index
    %9 = vector.load %arg4[%c0_6, %c0_7] : memref<128x128xf32, #tpu.memory_space<vmem>>, vector<128x128xf32>
    %cst_8 = arith.constant dense<0.000000e+00> : vector<8x128xf32>
    %10 = tpu.matmul %8, %9, %cst_8 {dimension_numbers = #tpu.dot_dimension_numbers<[1], [0], [0], [1], [0, 0, 1, 1], [], []>} : vector<8x128xf32>, vector<128x128xf32>, vector<8x128xf32> -> vector<8x128xf32>
    %c0_9 = arith.constant 0 : index
    %c0_10 = arith.constant 0 : index
    %11 = vector.load %arg5[%c0_9, %c0_10] : memref<1x128xf32, #tpu.memory_space<vmem>>, vector<1x128xf32>
    %12 = vector.broadcast %11 : vector<1x128xf32> to vector<8x128xf32>
    %13 = arith.addf %10, %12 : vector<8x128xf32>
    %cst_11 = arith.constant 0.00999999977 : f32
    %14 = vector.broadcast %cst_11 : f32 to vector<8x128xf32>
    %15 = arith.mulf %14, %13 : vector<8x128xf32>
    %16 = arith.maximumf %13, %15 : vector<8x128xf32>
    %c0_12 = arith.constant 0 : index
    %c0_13 = arith.constant 0 : index
    %17 = vector.load %arg6[%c0_12, %c0_13] : memref<128x128xf32, #tpu.memory_space<vmem>>, vector<128x128xf32>
    %cst_14 = arith.constant dense<0.000000e+00> : vector<8x128xf32>
    %18 = tpu.matmul %16, %17, %cst_14 {dimension_numbers = #tpu.dot_dimension_numbers<[1], [0], [0], [1], [0, 0, 1, 1], [], []>} : vector<8x128xf32>, vector<128x128xf32>, vector<8x128xf32> -> vector<8x128xf32>
    %c0_15 = arith.constant 0 : index
    %c0_16 = arith.constant 0 : index
    %19 = vector.load %arg7[%c0_15, %c0_16] : memref<1x128xf32, #tpu.memory_space<vmem>>, vector<1x128xf32>
    %20 = vector.broadcast %19 : vector<1x128xf32> to vector<8x128xf32>
    %21 = arith.addf %18, %20 : vector<8x128xf32>
    %cst_17 = arith.constant 0.00999999977 : f32
    %22 = vector.broadcast %cst_17 : f32 to vector<8x128xf32>
    %23 = arith.mulf %22, %21 : vector<8x128xf32>
    %24 = arith.maximumf %21, %23 : vector<8x128xf32>
    %c0_18 = arith.constant 0 : index
    %c0_19 = arith.constant 0 : index
    %25 = vector.load %arg8[%c0_18, %c0_19] : memref<128x128xf32, #tpu.memory_space<vmem>>, vector<128x128xf32>
    %cst_20 = arith.constant dense<0.000000e+00> : vector<8x128xf32>
    %26 = tpu.matmul %24, %25, %cst_20 {dimension_numbers = #tpu.dot_dimension_numbers<[1], [0], [0], [1], [0, 0, 1, 1], [], []>} : vector<8x128xf32>, vector<128x128xf32>, vector<8x128xf32> -> vector<8x128xf32>
    %c0_21 = arith.constant 0 : index
    %c0_22 = arith.constant 0 : index
    %27 = vector.load %arg9[%c0_21, %c0_22] : memref<1x128xf32, #tpu.memory_space<vmem>>, vector<1x128xf32>
    %28 = vector.broadcast %27 : vector<1x128xf32> to vector<8x128xf32>
    %29 = arith.addf %26, %28 : vector<8x128xf32>
    %cst_23 = arith.constant 0.00999999977 : f32
    %30 = vector.broadcast %cst_23 : f32 to vector<8x128xf32>
    %31 = arith.mulf %30, %29 : vector<8x128xf32>
    %32 = arith.maximumf %29, %31 : vector<8x128xf32>
    %c0_24 = arith.constant 0 : index
    %c0_25 = arith.constant 0 : index
    %33 = vector.load %arg10[%c0_24, %c0_25] : memref<8x128xf32, #tpu.memory_space<vmem>>, vector<8x128xf32>
    tpu.vector_store %arg10[%c0_24, %c0_25], %32 {strides = array<i32>} : memref<8x128xf32, #tpu.memory_space<vmem>>, vector<8x128xf32>,
    return
  }
  func.func @transform_0(%arg0: i32) -> (i32, i32) {
    %c0_i32 = arith.constant 0 : i32
    %c0_i32_0 = arith.constant 0 : i32
    return %arg0, %c0_i32 : i32, i32
  }
  func.func @transform_1(%arg0: i32) -> (i32, i32) {
    %c0_i32 = arith.constant 0 : i32
    %c0_i32_0 = arith.constant 0 : i32
    %c0_i32_1 = arith.constant 0 : i32
    return %c0_i32, %c0_i32_0 : i32, i32
  }
  func.func @transform_2(%arg0: i32) -> (i32, i32) {
    %c0_i32 = arith.constant 0 : i32
    %c0_i32_0 = arith.constant 0 : i32
    %c0_i32_1 = arith.constant 0 : i32
    return %c0_i32, %c0_i32_0 : i32, i32
  }
  func.func @transform_3(%arg0: i32) -> (i32, i32) {
    %c0_i32 = arith.constant 0 : i32
    %c0_i32_0 = arith.constant 0 : i32
    %c0_i32_1 = arith.constant 0 : i32
    return %c0_i32, %c0_i32_0 : i32, i32
  }
  func.func @transform_4(%arg0: i32) -> (i32, i32) {
    %c0_i32 = arith.constant 0 : i32
    %c0_i32_0 = arith.constant 0 : i32
    %c0_i32_1 = arith.constant 0 : i32
    return %c0_i32, %c0_i32_0 : i32, i32
  }
  func.func @transform_5(%arg0: i32) -> (i32, i32) {
    %c0_i32 = arith.constant 0 : i32
    %c0_i32_0 = arith.constant 0 : i32
    %c0_i32_1 = arith.constant 0 : i32
    return %c0_i32, %c0_i32_0 : i32, i32
  }
  func.func @transform_6(%arg0: i32) -> (i32, i32) {
    %c0_i32 = arith.constant 0 : i32
    %c0_i32_0 = arith.constant 0 : i32
    %c0_i32_1 = arith.constant 0 : i32
    return %c0_i32, %c0_i32_0 : i32, i32
  }
  func.func @transform_7(%arg0: i32) -> (i32, i32) {
    %c0_i32 = arith.constant 0 : i32
    %c0_i32_0 = arith.constant 0 : i32
    %c0_i32_1 = arith.constant 0 : i32
    return %c0_i32, %c0_i32_0 : i32, i32
  }
  func.func @transform_8(%arg0: i32) -> (i32, i32) {
    %c0_i32 = arith.constant 0 : i32
    %c0_i32_0 = arith.constant 0 : i32
    %c0_i32_1 = arith.constant 0 : i32
    return %c0_i32, %c0_i32_0 : i32, i32
  }
  func.func @transform_9(%arg0: i32) -> (i32, i32) {
    %c0_i32 = arith.constant 0 : i32
    %c0_i32_0 = arith.constant 0 : i32
    return %arg0, %c0_i32 : i32, i32
  }
}

</mosaic_0001>

<bundles_post_ra>
// kernel: tpu_custom_call.1
= control target key start
LH: loop header
LB: loop body
LE: loop exit
PB: predicated region body
PF: predicated region fallthrough
CT: control target
= control target key end

     0   :  { %14 = vsyncpa [#allocation3], 0  ;;  %s538_s0 = inlined_call_operand.hbm [shape: f32[8,8], index: 0, kind: input, shape index: {}]   ;;  %s539_s1 = inlined_call_operand.hbm [shape: f32[8,128], index: 1, kind: input, shape index: {}]   ;;  %s540_s2 = inlined_call_operand.vmem [shape: f32[1,128], index: 2, kind: input, shape index: {}]   ;;  %s541_s3 = inlined_call_operand.hbm [shape: f32[128,128], index: 3, kind: input, shape index: {}]   ;;  %s542_s4 = inlined_call_operand.vmem [shape: f32[1,128], index: 4, kind: input, shape index: {}]   ;;  %s543_s5 = inlined_call_operand.hbm [shape: f32[128,128], index: 5, kind: input, shape index: {}]   ;;  %s544_s6 = inlined_call_operand.vmem [shape: f32[1,128], index: 6, kind: input, shape index: {}]   ;;  %s545_s7 = inlined_call_operand.hbm [shape: f32[128,128], index: 7, kind: input, shape index: {}]   ;;  %s546_s8 = inlined_call_operand.vmem [shape: f32[1,128], index: 8, kind: input, shape index: {}]   ;;  %s547_s9 = inlined_call_operand.hbm [shape: f32[8,128], index: 9, kind: output, shape index: {}]  }
   0x1   :  { %15 = vsyncpa [#allocation6], 0 }
   0x2   :  { %16 = vsyncpa [#allocation9], 0  ;;  %s34_s11 = sshll.u32 %s539_s1, 4  ;;  %s35_s11 = int_to_ptr.hbm [resolvable:$true] %s34_s11 }
   0x3   :  { %17 = vsyncpa [#allocation4], 0  ;;  %s450_s12 = smov [#allocation5]   ;;  %s61_s16 = sshll.u32 %s543_s5, 4  ;;  %s62_s16 = int_to_ptr.hbm [resolvable:$true] %s61_s16 }
   0x4   :  { %s36_s13 = sshll.u32 %s450_s12, 4  ;;  %s451_s17 = smov [#allocation8]   ;;  %s37_s13 = int_to_ptr.vmem [resolvable:$true] %s36_s13 }
   0x5   :  { %39 = dma.hbm_to_vmem [thread:$0]  %s35_s11, 128, %s37_s13, [#allocation6]  }
   0x6   :  { %s63_s18 = sshll.u32 %s451_s17, 4  ;;  %s23_s21 = sshll.u32 %s538_s0, 4  ;;  %s64_s18 = int_to_ptr.vmem [resolvable:$true] %s63_s18  ;;  %s24_s21 = int_to_ptr.hbm [resolvable:$true] %s23_s21 }
   0x7   :  { %s452_s1 = smov 128   ;;  %s453_s22 = smov 8  }
   0x8   :  { %69 = dma.hbm_to_vmem [thread:$0]  %s62_s16, 2048, %s64_s18, [#allocation9], %s452_s1, %s452_s1, %s453_s22  }
   0x9   :  { %s46_s25 = sshll.u32 %s541_s3, 4  ;;  %s454_s26 = smov [#allocation2]   ;;  %s47_s25 = int_to_ptr.hbm [resolvable:$true] %s46_s25 }
   0xa   :  { %s25_s27 = sshll.u32 %s454_s26, 4  ;;  %s455_s5 = smov [#allocation7]   ;;  %s26_s27 = int_to_ptr.vmem [resolvable:$true] %s25_s27 }
   0xb   :  { %28 = dma.hbm_to_vmem [thread:$0]  %s24_s21, 128, %s26_s27, [#allocation3]  }
   0xc   :  { %s48_s28 = sshll.u32 %s455_s5, 4  ;;  %s76_s0 = sshll.u32 %s545_s7, 4  ;;  %s49_s28 = int_to_ptr.vmem [resolvable:$true] %s48_s28  ;;  %s77_s0 = int_to_ptr.hbm [resolvable:$true] %s76_s0 }
   0xd   :  { %54 = dma.hbm_to_vmem [thread:$0]  %s47_s25, 2048, %s49_s28, [#allocation6], %s452_s1, %s452_s1, %s453_s22  }
   0xe   :  { %s456_s10 = smov [#allocation10]  }
   0xf   :  { %s78_s11 = sshll.u32 %s456_s10, 4  ;;  %s79_s11 = int_to_ptr.vmem [resolvable:$true] %s78_s11 }
  0x10   :  { %84 = dma.hbm_to_vmem [thread:$0]  %s77_s0, 2048, %s79_s11, [#allocation9], %s452_s1, %s452_s1, %s453_s22  }
  0x11   :  { %442 = dma.done.wait [#allocation3], 128  }
  0x12   :  { %443 = vsyncadd [#allocation3], 4294967168 }
  0x13   :  { %444 = dma.done.wait [#allocation6], 2176  }
  0x14   :  { %445 = vsyncadd [#allocation6], 4294965120 }
  0x15   :  { %446 = dma.done.wait [#allocation9], 4096  }
  0x16   :  { %447 = vsyncadd [#allocation9], 4294963200  ;;  %vm113_vm0 = vcmask 64512   ;;  %v108_v0 = vld [vmem:[#allocation5] sm:$0xff]  ;;  %v107_v1 = vld [vmem:[#allocation2] sm:$0xff]  ;;  %s457_s16 = smov [#allocation11]  }
  0x17   :  { %v154_v2 = vld [vmem:[#allocation7 + $0x78] sm:$0xff]  ;;  %132 = vmatpush.msra.mxu0 %v108_v0  ;;  %v153_v3 = vld [vmem:[#allocation7 + $0x70] sm:$0xff]  ;;  %v152_v4 = vld [vmem:[#allocation7 + $0x68] sm:$0xff]  ;;  %s271_s17 = sshll.u32 %s457_s16, 4  ;;  %s273_s20 = sshll.u32 %s547_s9, 4  ;;  %s272_s17 = int_to_ptr.vmem [resolvable:$true] %s271_s17  ;;  %s274_s20 = int_to_ptr.hbm [resolvable:$true] %s273_s20 }
  0x18   :  { %159 = vmatpush.msra.mxu1 %v154_v2  ;;  %285 = vmatmul.msk.f32.vlgmr.msra.gmra.mxu0 %vm113_vm0, %v107_v1  ;;  %v151_v5 = vld [vmem:[#allocation7 + $0x60] sm:$0xff]  ;;  %v150_v6 = vld [vmem:[#allocation7 + $0x58] sm:$0xff]  ;;  %v149_v7 = vld [vmem:[#allocation7 + $0x50] sm:$0xff] }
  0x19   :  { %v148_v8 = vld [vmem:[#allocation7 + $0x48] sm:$0xff]  ;;  %v147_v9 = vld [vmem:[#allocation7 + $0x40] sm:$0xff]  ;;  %v146_v10 = vld [vmem:[#allocation7 + $0x38] sm:$0xff] }
  0x1a   :  { %160 = vmatpush.msra.mxu1 %v153_v3  ;;  %v145_v11 = vld [vmem:[#allocation7 + $0x30] sm:$0xff]  ;;  %v144_v12 = vld [vmem:[#allocation7 + $0x28] sm:$0xff]  ;;  %v143_v13 = vld [vmem:[#allocation7 + $0x20] sm:$0xff] }
  0x1b   :  { %v142_v14 = vld [vmem:[#allocation7 + $0x18] sm:$0xff]  ;;  %v141_v15 = vld [vmem:[#allocation7 + $0x10] sm:$0xff]  ;;  %v140_v16 = vld [vmem:[#allocation7 + $0x8] sm:$0xff] }
  0x1c   :  { %161 = vmatpush.msra.mxu1 %v152_v4  ;;  %v139_v17 = vld [vmem:[#allocation7] sm:$0xff]  ;;  %v196_v18 = vld [vmem:[#allocation8 + $0x78] sm:$0xff]  ;;  %v195_v19 = vld [vmem:[#allocation8 + $0x70] sm:$0xff] }
  0x1d   :  { %201 = vmatpush.msra.mxu2 %v196_v18  ;;  %v194_v20 = vld [vmem:[#allocation8 + $0x68] sm:$0xff]  ;;  %v193_v21 = vld [vmem:[#allocation8 + $0x60] sm:$0xff]  ;;  %v192_v22 = vld [vmem:[#allocation8 + $0x58] sm:$0xff] }
  0x1e   :  { %162 = vmatpush.msra.mxu1 %v151_v5  ;;  %v191_v23 = vld [vmem:[#allocation8 + $0x50] sm:$0xff]  ;;  %v190_v24 = vld [vmem:[#allocation8 + $0x48] sm:$0xff]  ;;  %v189_v25 = vld [vmem:[#allocation8 + $0x40] sm:$0xff] }
  0x1f   :  { %202 = vmatpush.msra.mxu2 %v195_v19  ;;  %v188_v26 = vld [vmem:[#allocation8 + $0x38] sm:$0xff]  ;;  %v187_v27 = vld [vmem:[#allocation8 + $0x30] sm:$0xff]  ;;  %v186_v28 = vld [vmem:[#allocation8 + $0x28] sm:$0xff] }
  0x20   :  { %163 = vmatpush.msra.mxu1 %v150_v6  ;;  %v185_v29 = vld [vmem:[#allocation8 + $0x20] sm:$0xff]  ;;  %v294_v30 = vld [vmem:[%s540_s2] ss:$0 sm:$0xff]  ;;  %v184_v35 = vld [vmem:[#allocation8 + $0x18] sm:$0xff] }
  0x21   :  { %203 = vmatpush.msra.mxu2 %v194_v20  ;;  %v183_v36 = vld [vmem:[#allocation8 + $0x10] sm:$0xff]  ;;  %v182_v37 = vld [vmem:[#allocation8 + $0x8] sm:$0xff]  ;;  %v181_v38 = vld [vmem:[#allocation8] sm:$0xff] }
  0x22   :  { %164 = vmatpush.msra.mxu1 %v149_v7  ;;  %v238_v39 = vld [vmem:[#allocation10 + $0x78] sm:$0xff]  ;;  %v237_v40 = vld [vmem:[#allocation10 + $0x70] sm:$0xff]  ;;  %v236_v41 = vld [vmem:[#allocation10 + $0x68] sm:$0xff] }
  0x23   :  { %204 = vmatpush.msra.mxu2 %v193_v21  ;;  %243 = vmatpush.msra.mxu3 %v238_v39  ;;  %v235_v42 = vld [vmem:[#allocation10 + $0x60] sm:$0xff]  ;;  %v234_v43 = vld [vmem:[#allocation10 + $0x58] sm:$0xff]  ;;  %v233_v44 = vld [vmem:[#allocation10 + $0x50] sm:$0xff] }
  0x24   :  { %165 = vmatpush.msra.mxu1 %v148_v8  ;;  %v232_v45 = vld [vmem:[#allocation10 + $0x48] sm:$0xff]  ;;  %v231_v46 = vld [vmem:[#allocation10 + $0x40] sm:$0xff]  ;;  %v230_v47 = vld [vmem:[#allocation10 + $0x38] sm:$0xff] }
  0x25   :  { %205 = vmatpush.msra.mxu2 %v192_v22  ;;  %244 = vmatpush.msra.mxu3 %v237_v40  ;;  %v229_v48 = vld [vmem:[#allocation10 + $0x30] sm:$0xff]  ;;  %v228_v49 = vld [vmem:[#allocation10 + $0x28] sm:$0xff]  ;;  %v227_v50 = vld [vmem:[#allocation10 + $0x20] sm:$0xff] }
  0x26   :  { %166 = vmatpush.msra.mxu1 %v147_v9  ;;  %v295_v51 = vld [vmem:[%s542_s4] ss:$0 sm:$0xff]  ;;  %v226_v56 = vld [vmem:[#allocation10 + $0x18] sm:$0xff]  ;;  %v224_v58 = vld [vmem:[#allocation10 + $0x8] sm:$0xff] }
  0x27   :  { %206 = vmatpush.msra.mxu2 %v191_v23  ;;  %245 = vmatpush.msra.mxu3 %v236_v41  ;;  %v225_v57 = vld [vmem:[#allocation10 + $0x10] sm:$0xff]  ;;  %v223_v59 = vld [vmem:[#allocation10] sm:$0xff] }
  0x28   :  { %167 = vmatpush.msra.mxu1 %v146_v10  ;;  %v296_v60 = vld [vmem:[%s544_s6] ss:$0 sm:$0xff] }
  0x29   :  { %207 = vmatpush.msra.mxu2 %v190_v24  ;;  %246 = vmatpush.msra.mxu3 %v235_v42  ;;  %v297_v1 = vld [vmem:[%s546_s8] ss:$0 sm:$0xff] }
  0x2a   :  { %168 = vmatpush.msra.mxu1 %v145_v11 }
  0x2b   :  { %208 = vmatpush.msra.mxu2 %v189_v25  ;;  %247 = vmatpush.msra.mxu3 %v234_v43 }
  0x2c   :  { %169 = vmatpush.msra.mxu1 %v144_v12 }
  0x2d   :  { %209 = vmatpush.msra.mxu2 %v188_v26  ;;  %248 = vmatpush.msra.mxu3 %v233_v44 }
  0x2e   :  { %170 = vmatpush.msra.mxu1 %v143_v13 }
  0x2f   :  { %210 = vmatpush.msra.mxu2 %v187_v27  ;;  %249 = vmatpush.msra.mxu3 %v232_v45 }
  0x30   :  { %171 = vmatpush.msra.mxu1 %v142_v14 }
  0x31   :  { %211 = vmatpush.msra.mxu2 %v186_v28  ;;  %250 = vmatpush.msra.mxu3 %v231_v46 }
  0x32   :  { %172 = vmatpush.msra.mxu1 %v141_v15 }
  0x33   :  { %212 = vmatpush.msra.mxu2 %v185_v29  ;;  %251 = vmatpush.msra.mxu3 %v230_v47 }
  0x34   :  { %173 = vmatpush.msra.mxu1 %v140_v16 }
  0x35   :  { %213 = vmatpush.msra.mxu2 %v184_v35  ;;  %252 = vmatpush.msra.mxu3 %v229_v48 }
  0x36   :  { %174 = vmatpush.msra.mxu1 %v139_v17 }
  0x37   :  { %214 = vmatpush.msra.mxu2 %v183_v36  ;;  %253 = vmatpush.msra.mxu3 %v228_v49 }
  0x39   :  { %215 = vmatpush.msra.mxu2 %v182_v37  ;;  %254 = vmatpush.msra.mxu3 %v227_v50 }
  0x3b   :  { %216 = vmatpush.msra.mxu2 %v181_v38  ;;  %255 = vmatpush.msra.mxu3 %v226_v56 }
  0x3d   :  { %256 = vmatpush.msra.mxu3 %v225_v57 }
  0x3f   :  { %257 = vmatpush.msra.mxu3 %v224_v58 }
  0x41   :  { %258 = vmatpush.msra.mxu3 %v223_v59 }
  0x95   :  { %v134_v31 = vpop.f32.mrf.mxu0 }
  0x96   :  { %v135_v32 = vadd.f32 %v294_v30, %v134_v31 }
  0x98   :  { %v137_v33 = vmul.f32 0.01, %v135_v32 }
  0x9a   :  { %v138_v34 = vmax.f32 %v135_v32, %v137_v33 }
  0x9c   :  { %175 = vmatmul.f32.vlgmr.msra.gmra.mxu1 %v138_v34 }
 0x119   :  { %v176_v52 = vpop.f32.mrf.mxu1 }
 0x11a   :  { %v177_v53 = vadd.f32 %v295_v51, %v176_v52 }
 0x11c   :  { %v179_v54 = vmul.f32 0.01, %v177_v53 }
 0x11e   :  { %v180_v55 = vmax.f32 %v177_v53, %v179_v54 }
 0x120   :  { %217 = vmatmul.f32.vlgmr.msra.gmra.mxu2 %v180_v55 }
 0x1a3   :  { %v218_v61 = vpop.f32.mrf.mxu2 }
 0x1a4   :  { %v219_v62 = vadd.f32 %v296_v60, %v218_v61 }
 0x1a6   :  { %v221_v63 = vmul.f32 0.01, %v219_v62 }
 0x1a8   :  { %v222_v0 = vmax.f32 %v219_v62, %v221_v63 }
 0x1aa   :  { %259 = vmatmul.f32.vlgmr.msra.gmra.mxu3 %v222_v0 }
 0x22d   :  { %v260_v2 = vpop.f32.mrf.mxu3 }
 0x22e   :  { %v261_v3 = vadd.f32 %v297_v1, %v260_v2 }
 0x230   :  { %v263_v4 = vmul.f32 0.01, %v261_v3 }
 0x232   :  { %v264_v5 = vmax.f32 %v261_v3, %v263_v4 }
 0x234   :  { %265 = vst [vmem:[#allocation11] sm:$0xff] %v264_v5 }
 0x235   :  { %276 = dma.vmem_to_hbm [thread:$0]  %s272_s17, 128, %s274_s20, [#allocation4]  }
 0x236   :  { %448 = dma.done.wait [#allocation4], 128  }
 0x237   :  { %449 = vsyncadd [#allocation4], 4294967168 }
 0x238   :  { %281 = vsyncpa [#allocation3], 1 }
 0x239   :  { %282 = vsyncpa [#allocation6], 1 }
 0x23a   :  { %283 = vsyncpa [#allocation9], 1 }
 0x23b   :  { %284 = vsyncpa [#allocation4], 1 }

</bundles_post_ra>
